<compile_context>
chip_gen: v7x
topology: tpu7x:2x2x1
jax: 0.10.0
libtpu: 0.0.40
codegen_flags: <defaults>
</compile_context>

<pallas_src>
import functools
import math

import jax
import jax.numpy as jnp
from jax.experimental import pallas as pl
from jax.experimental.pallas import tpu as pltpu


def _bias_kernel(emb_t_ref, out_ref, *, n, rows, num_buckets, max_distance,
                 scale):
    """One grid step: compute `rows` full output rows [i0, i0+rows)."""
    i0 = pl.program_id(0) * rows          # first output row of this tile
    lw = rows + n - 1                     # number of diagonals these rows touch

    # Window slot m corresponds to relative position d = j - i:
    #   row r (i = i0 + r), column j  ->  m = (rows - 1 - r) + j
    #   =>  d = j - i = m - (rows - 1) - i0   (independent of r)
    m = jax.lax.broadcasted_iota(jnp.int32, (1, lw), 1)
    d = m - (rows - 1) - i0

    # ---- T5 _relative_position_bucket (exact port of the torch code) ------
    neg = -d                                            # torch: n = -rel_pos
    half = num_buckets // 2
    bucket = jnp.where(neg < 0, half, 0).astype(jnp.int32)
    n_abs = jnp.abs(neg)
    max_exact = half // 2
    is_small = n_abs < max_exact
    # Clamp log arg away from 0: clamped entries are masked by is_small, this
    # just avoids -inf flowing through the float->int32 cast.
    safe = jnp.maximum(n_abs, 1).astype(jnp.float32)
    val_if_large = max_exact + (
        jnp.log(safe / float(max_exact))
        / math.log(max_distance / max_exact)
        * (half - max_exact)
    ).astype(jnp.int32)
    val_if_large = jnp.minimum(val_if_large, half - 1)
    bucket = bucket + jnp.where(is_small, n_abs, val_if_large)      # (1, lw)

    # ---- embedding lookup of the tiny diagonal table: one-hot MXU matmul --
    b_iota = jax.lax.broadcasted_iota(jnp.int32, (num_buckets, lw), 0)
    onehot = (b_iota == bucket).astype(jnp.float32)                 # (B, lw)
    window = jnp.dot(emb_t_ref[...] * scale, onehot,
                     preferred_element_type=jnp.float32)            # (heads, lw)
    window = window.astype(out_ref.dtype)

    # ---- Toeplitz fill: row i0+r is the window shifted by (rows - 1 - r) --
    # Static unroll => static lane slices + (when n % 128 == 0) dense stores.
    for r in range(rows):
        c = rows - 1 - r
        out_ref[:, r * n:(r + 1) * n] = window[:, c:c + n]


def _choose_rows_per_tile(n, heads, itemsize=4, target_bytes=4 << 20,
                          max_rows=128):
    """Rows per tile: bounded bytes, lane-aligned (rows*n % 128 == 0) if possible."""
    cap = max(1, min(n, max_rows, target_bytes // max(1, heads * n * itemsize)))
    step = 128 // math.gcd(n, 128)   # smallest row count with rows*n % 128 == 0
    if step <= cap:
        rows = (cap // step) * step
        for cand in range(rows, 0, -step):    # prefer dividing n (no row pad)
            if n % cand == 0:
                return cand
        return rows                            # lane-aligned, rows get padded
    if step <= 4 * n and heads * step * n * itemsize <= (6 << 20):
        return step                            # large awkward n: pad rows
    for cand in range(cap, 0, -1):             # tiny n: single/few full blocks
        if n % cand == 0:
            return cand
    return 1


def t5_relative_position_bias(emb, n, *, num_buckets=None, max_distance=128,
                              scale=1.0, rows_per_tile=None,
                              out_dtype=jnp.float32):
    """emb: (num_buckets, heads).  Returns bias of shape (heads, n, n)."""
    assert n >= 1
    nb, heads = emb.shape
    num_buckets = nb if num_buckets is None else num_buckets
    assert num_buckets == nb, "num_buckets must match emb.shape[0]"

    itemsize = jnp.dtype(out_dtype).itemsize
    rows = (rows_per_tile if rows_per_tile is not None
            else _choose_rows_per_tile(n, heads, itemsize))
    n_rows = pl.cdiv(n, rows) * rows          # padded row count (grid divides)
    num_tiles = n_rows // rows
    tile = rows * n                           # lanes per output block
    total = n_rows * n
    # Mosaic block-shape constraint: lane dim multiple of 128 or full extent.
    assert tile % 128 == 0 or tile == total, (
        "unsupported (n, rows) combination; add column tiling for this n")

    # Pre-transpose the tiny (num_buckets, heads) table once in the wrapper so
    # the in-kernel MXU gather has no transposed-LHS contraction.
    emb_t = jnp.transpose(emb)                # (heads, num_buckets)

    kernel = functools.partial(
        _bias_kernel, n=n, rows=rows, num_buckets=num_buckets,
        max_distance=max_distance, scale=float(scale))

    out_flat = pl.pallas_call(
        kernel,
        out_shape=jax.ShapeDtypeStruct((heads, total), out_dtype),
        grid=(num_tiles,),
        in_specs=[pl.BlockSpec((heads, num_buckets), lambda i: (0, 0))],
        out_specs=pl.BlockSpec((heads, tile), lambda i: (0, i)),
        compiler_params=pltpu.CompilerParams(
            dimension_semantics=("parallel",)),
    )(emb_t)

    # (heads, n_rows*n) -> (heads, n_rows, n) is a metadata-only reshape.
    out = out_flat.reshape(heads, n_rows, n)
    if n_rows != n:
        out = out[:, :n, :]                   # drop padded rows (copy only then)
    return out


def _reference(emb, n, *, num_buckets=32, max_distance=128, scale=1.0):
    pos = jnp.arange(n, dtype=jnp.int32)
    rel_pos = pos[None, :] - pos[:, None]
    neg = -rel_pos
    half = num_buckets // 2
    ret = jnp.where(neg < 0, half, 0).astype(jnp.int32)
    n_abs = jnp.abs(neg)
    max_exact = half // 2
    is_small = n_abs < max_exact
    val_if_large = max_exact + (
        jnp.log(jnp.maximum(n_abs, 1).astype(jnp.float32) / max_exact)
        / math.log(max_distance / max_exact)
        * (half - max_exact)
    ).astype(jnp.int32)
    val_if_large = jnp.minimum(val_if_large, half - 1)
    buckets = ret + jnp.where(is_small, n_abs, val_if_large)
    values = emb[buckets]                      # (n, n, heads)
    return jnp.transpose(values, (2, 0, 1)) * scale


if __name__ == "__main__":
    num_buckets, max_distance, heads = 32, 128, 8

    key = jax.random.PRNGKey(0)
    # nn.Embedding(num_buckets, heads) default init: N(0, 1)
    emb = jax.random.normal(key, (num_buckets, heads), dtype=jnp.float32)

    # Case 1: tiny n -> single block (tile == full flat output).
    n1 = 8
    b1 = jax.block_until_ready(
        t5_relative_position_bias(emb, n1, max_distance=max_distance))
    r1 = _reference(emb, n1, num_buckets=num_buckets, max_distance=max_distance)
    assert b1.shape == (heads, n1, n1), b1.shape
    assert jnp.allclose(b1, r1, atol=1e-5, rtol=1e-5), "mismatch (n=8)"

    # Case 2: multi-step grid (2 lane-aligned 128-lane tiles) + scale folding.
    n2 = 16
    b2 = jax.block_until_ready(
        t5_relative_position_bias(emb, n2, max_distance=max_distance,
                                  scale=0.5, rows_per_tile=8))
    r2 = _reference(emb, n2, num_buckets=num_buckets, max_distance=max_distance,
                    scale=0.5)
    assert b2.shape == (heads, n2, n2), b2.shape
    assert jnp.allclose(b2, r2, atol=1e-5, rtol=1e-5), "mismatch (n=16, tiled)"

    # Case 3: automatic tile choice.
    n3 = 16
    b3 = jax.block_until_ready(
        t5_relative_position_bias(emb, n3, max_distance=max_distance))
    r3 = _reference(emb, n3, num_buckets=num_buckets, max_distance=max_distance)
    assert b3.shape == (heads, n3, n3), b3.shape
    assert jnp.allclose(b3, r3, atol=1e-5, rtol=1e-5), "mismatch (n=16, auto)"

    print("KERNEL_OK")
</pallas_src>

<mosaic_0001>
module attributes {stable_mosaic.version = 11 : i64} {
  func.func @_bias_kernel(%arg0: i32, %arg1: memref<8x32xf32, #tpu.memory_space<vmem>>, %arg2: memref<8x128xf32, #tpu.memory_space<vmem>>) attributes {dimension_semantics = [#tpu.dimension_semantics<parallel>], iteration_bounds = array<i64: 1>, scalar_prefetch = 0 : i64, scratch_operands = 0 : i64, tpu.core_type = #tpu.core_type<tc>, window_params = [{pipeline_mode = #tpu.pipeline_mode<synchronous>, transform_indices = @transform_0, window_bounds = array<i64: 8, 32>}, {transform_indices = @transform_1, window_bounds = array<i64: 8, 128>}]} {
    %c16_i32 = arith.constant 16 : i32
    %0 = arith.muli %arg0, %c16_i32 : i32
    %1 = tpu.iota {dimensions = array<i32: 1>} : vector<1x23xi32>
    %c15_i32 = arith.constant 15 : i32
    %2 = vector.broadcast %c15_i32 : i32 to vector<1x23xi32>
    %3 = arith.subi %1, %2 : vector<1x23xi32>
    %4 = vector.broadcast %0 : i32 to vector<1x23xi32>
    %5 = arith.subi %3, %4 : vector<1x23xi32>
    %c0_i32 = arith.constant 0 : i32
    %6 = vector.broadcast %c0_i32 : i32 to vector<1x23xi32>
    %7 = arith.subi %6, %5 : vector<1x23xi32>
    %c0_i32_0 = arith.constant 0 : i32
    %8 = vector.broadcast %c0_i32_0 : i32 to vector<1x23xi32>
    %9 = arith.cmpi slt, %7, %8 : vector<1x23xi32>
    %c16_i32_1 = arith.constant 16 : i32
    %c0_i32_2 = arith.constant 0 : i32
    %10 = vector.broadcast %c16_i32_1 : i32 to vector<1x23xi32>
    %11 = vector.broadcast %c0_i32_2 : i32 to vector<1x23xi32>
    %12 = arith.select %9, %10, %11 : vector<1x23xi1>, vector<1x23xi32>
    %13 = math.absi %7 : vector<1x23xi32>
    %c8_i32 = arith.constant 8 : i32
    %14 = vector.broadcast %c8_i32 : i32 to vector<1x23xi32>
    %15 = arith.cmpi slt, %13, %14 : vector<1x23xi32>
    %c1_i32 = arith.constant 1 : i32
    %16 = vector.broadcast %c1_i32 : i32 to vector<1x23xi32>
    %17 = arith.maxsi %13, %16 : vector<1x23xi32>
    %18 = arith.sitofp %17 : vector<1x23xi32> to vector<1x23xf32>
    %cst = arith.constant 8.000000e+00 : f32
    %19 = vector.broadcast %cst : f32 to vector<1x23xf32>
    %20 = arith.divf %18, %19 : vector<1x23xf32>
    %21 = math.log %20 : vector<1x23xf32>
    %cst_3 = arith.constant 2.77258873 : f32
    %22 = vector.broadcast %cst_3 : f32 to vector<1x23xf32>
    %23 = arith.divf %21, %22 : vector<1x23xf32>
    %cst_4 = arith.constant 8.000000e+00 : f32
    %24 = vector.broadcast %cst_4 : f32 to vector<1x23xf32>
    %25 = arith.mulf %23, %24 : vector<1x23xf32>
    %26 = arith.fptosi %25 : vector<1x23xf32> to vector<1x23xi32>
    %c8_i32_5 = arith.constant 8 : i32
    %27 = vector.broadcast %c8_i32_5 : i32 to vector<1x23xi32>
    %28 = arith.addi %27, %26 : vector<1x23xi32>
    %c15_i32_6 = arith.constant 15 : i32
    %29 = vector.broadcast %c15_i32_6 : i32 to vector<1x23xi32>
    %30 = arith.minsi %28, %29 : vector<1x23xi32>
    %31 = arith.select %15, %13, %30 : vector<1x23xi1>, vector<1x23xi32>
    %32 = arith.addi %12, %31 : vector<1x23xi32>
    %33 = tpu.iota {dimensions = array<i32: 0>} : vector<32x23xi32>
    %34 = vector.broadcast %32 : vector<1x23xi32> to vector<32x23xi32>
    %35 = arith.cmpi eq, %33, %34 : vector<32x23xi32>
    %36 = arith.extui %35 : vector<32x23xi1> to vector<32x23xi32>
    %37 = arith.sitofp %36 : vector<32x23xi32> to vector<32x23xf32>
    %c0 = arith.constant 0 : index
    %c0_7 = arith.constant 0 : index
    %38 = vector.load %arg1[%c0, %c0_7] : memref<8x32xf32, #tpu.memory_space<vmem>>, vector<8x32xf32>
    %cst_8 = arith.constant 1.000000e+00 : f32
    %39 = vector.broadcast %cst_8 : f32 to vector<8x32xf32>
    %40 = arith.mulf %38, %39 : vector<8x32xf32>
    %cst_9 = arith.constant dense<0.000000e+00> : vector<8x23xf32>
    %41 = tpu.matmul %40, %37, %cst_9 {dimension_numbers = #tpu.dot_dimension_numbers<[1], [0], [0], [1], [0, 0, 1, 1], [], []>} : vector<8x32xf32>, vector<32x23xf32>, vector<8x23xf32> -> vector<8x23xf32>
    %42 = vector.extract_strided_slice %41 {offsets = [0, 15], sizes = [8, 8], strides = [1, 1]} : vector<8x23xf32> to vector<8x8xf32>
    %c0_10 = arith.constant 0 : index
    %c0_11 = arith.constant 0 : index
    %43 = vector.load %arg2[%c0_10, %c0_11] : memref<8x128xf32, #tpu.memory_space<vmem>>, vector<8x8xf32>
    tpu.vector_store %arg2[%c0_10, %c0_11], %42 {strides = array<i32>} : memref<8x128xf32, #tpu.memory_space<vmem>>, vector<8x8xf32>,
    %44 = vector.extract_strided_slice %41 {offsets = [0, 14], sizes = [8, 8], strides = [1, 1]} : vector<8x23xf32> to vector<8x8xf32>
    %c0_12 = arith.constant 0 : index
    %c8 = arith.constant 8 : index
    %45 = vector.load %arg2[%c0_12, %c8] : memref<8x128xf32, #tpu.memory_space<vmem>>, vector<8x8xf32>
    tpu.vector_store %arg2[%c0_12, %c8], %44 {strides = array<i32>} : memref<8x128xf32, #tpu.memory_space<vmem>>, vector<8x8xf32>,
    %46 = vector.extract_strided_slice %41 {offsets = [0, 13], sizes = [8, 8], strides = [1, 1]} : vector<8x23xf32> to vector<8x8xf32>
    %c0_13 = arith.constant 0 : index
    %c16 = arith.constant 16 : index
    %47 = vector.load %arg2[%c0_13, %c16] : memref<8x128xf32, #tpu.memory_space<vmem>>, vector<8x8xf32>
    tpu.vector_store %arg2[%c0_13, %c16], %46 {strides = array<i32>} : memref<8x128xf32, #tpu.memory_space<vmem>>, vector<8x8xf32>,
    %48 = vector.extract_strided_slice %41 {offsets = [0, 12], sizes = [8, 8], strides = [1, 1]} : vector<8x23xf32> to vector<8x8xf32>
    %c0_14 = arith.constant 0 : index
    %c24 = arith.constant 24 : index
    %49 = vector.load %arg2[%c0_14, %c24] : memref<8x128xf32, #tpu.memory_space<vmem>>, vector<8x8xf32>
    tpu.vector_store %arg2[%c0_14, %c24], %48 {strides = array<i32>} : memref<8x128xf32, #tpu.memory_space<vmem>>, vector<8x8xf32>,
    %50 = vector.extract_strided_slice %41 {offsets = [0, 11], sizes = [8, 8], strides = [1, 1]} : vector<8x23xf32> to vector<8x8xf32>
    %c0_15 = arith.constant 0 : index
    %c32 = arith.constant 32 : index
    %51 = vector.load %arg2[%c0_15, %c32] : memref<8x128xf32, #tpu.memory_space<vmem>>, vector<8x8xf32>
    tpu.vector_store %arg2[%c0_15, %c32], %50 {strides = array<i32>} : memref<8x128xf32, #tpu.memory_space<vmem>>, vector<8x8xf32>,
    %52 = vector.extract_strided_slice %41 {offsets = [0, 10], sizes = [8, 8], strides = [1, 1]} : vector<8x23xf32> to vector<8x8xf32>
    %c0_16 = arith.constant 0 : index
    %c40 = arith.constant 40 : index
    %53 = vector.load %arg2[%c0_16, %c40] : memref<8x128xf32, #tpu.memory_space<vmem>>, vector<8x8xf32>
    tpu.vector_store %arg2[%c0_16, %c40], %52 {strides = array<i32>} : memref<8x128xf32, #tpu.memory_space<vmem>>, vector<8x8xf32>,
    %54 = vector.extract_strided_slice %41 {offsets = [0, 9], sizes = [8, 8], strides = [1, 1]} : vector<8x23xf32> to vector<8x8xf32>
    %c0_17 = arith.constant 0 : index
    %c48 = arith.constant 48 : index
    %55 = vector.load %arg2[%c0_17, %c48] : memref<8x128xf32, #tpu.memory_space<vmem>>, vector<8x8xf32>
    tpu.vector_store %arg2[%c0_17, %c48], %54 {strides = array<i32>} : memref<8x128xf32, #tpu.memory_space<vmem>>, vector<8x8xf32>,
    %56 = vector.extract_strided_slice %41 {offsets = [0, 8], sizes = [8, 8], strides = [1, 1]} : vector<8x23xf32> to vector<8x8xf32>
    %c0_18 = arith.constant 0 : index
    %c56 = arith.constant 56 : index
    %57 = vector.load %arg2[%c0_18, %c56] : memref<8x128xf32, #tpu.memory_space<vmem>>, vector<8x8xf32>
    tpu.vector_store %arg2[%c0_18, %c56], %56 {strides = array<i32>} : memref<8x128xf32, #tpu.memory_space<vmem>>, vector<8x8xf32>,
    %58 = vector.extract_strided_slice %41 {offsets = [0, 7], sizes = [8, 8], strides = [1, 1]} : vector<8x23xf32> to vector<8x8xf32>
    %c0_19 = arith.constant 0 : index
    %c64 = arith.constant 64 : index
    %59 = vector.load %arg2[%c0_19, %c64] : memref<8x128xf32, #tpu.memory_space<vmem>>, vector<8x8xf32>
    tpu.vector_store %arg2[%c0_19, %c64], %58 {strides = array<i32>} : memref<8x128xf32, #tpu.memory_space<vmem>>, vector<8x8xf32>,
    %60 = vector.extract_strided_slice %41 {offsets = [0, 6], sizes = [8, 8], strides = [1, 1]} : vector<8x23xf32> to vector<8x8xf32>
    %c0_20 = arith.constant 0 : index
    %c72 = arith.constant 72 : index
    %61 = vector.load %arg2[%c0_20, %c72] : memref<8x128xf32, #tpu.memory_space<vmem>>, vector<8x8xf32>
    tpu.vector_store %arg2[%c0_20, %c72], %60 {strides = array<i32>} : memref<8x128xf32, #tpu.memory_space<vmem>>, vector<8x8xf32>,
    %62 = vector.extract_strided_slice %41 {offsets = [0, 5], sizes = [8, 8], strides = [1, 1]} : vector<8x23xf32> to vector<8x8xf32>
    %c0_21 = arith.constant 0 : index
    %c80 = arith.constant 80 : index
    %63 = vector.load %arg2[%c0_21, %c80] : memref<8x128xf32, #tpu.memory_space<vmem>>, vector<8x8xf32>
    tpu.vector_store %arg2[%c0_21, %c80], %62 {strides = array<i32>} : memref<8x128xf32, #tpu.memory_space<vmem>>, vector<8x8xf32>,
    %64 = vector.extract_strided_slice %41 {offsets = [0, 4], sizes = [8, 8], strides = [1, 1]} : vector<8x23xf32> to vector<8x8xf32>
    %c0_22 = arith.constant 0 : index
    %c88 = arith.constant 88 : index
    %65 = vector.load %arg2[%c0_22, %c88] : memref<8x128xf32, #tpu.memory_space<vmem>>, vector<8x8xf32>
    tpu.vector_store %arg2[%c0_22, %c88], %64 {strides = array<i32>} : memref<8x128xf32, #tpu.memory_space<vmem>>, vector<8x8xf32>,
    %66 = vector.extract_strided_slice %41 {offsets = [0, 3], sizes = [8, 8], strides = [1, 1]} : vector<8x23xf32> to vector<8x8xf32>
    %c0_23 = arith.constant 0 : index
    %c96 = arith.constant 96 : index
    %67 = vector.load %arg2[%c0_23, %c96] : memref<8x128xf32, #tpu.memory_space<vmem>>, vector<8x8xf32>
    tpu.vector_store %arg2[%c0_23, %c96], %66 {strides = array<i32>} : memref<8x128xf32, #tpu.memory_space<vmem>>, vector<8x8xf32>,
    %68 = vector.extract_strided_slice %41 {offsets = [0, 2], sizes = [8, 8], strides = [1, 1]} : vector<8x23xf32> to vector<8x8xf32>
    %c0_24 = arith.constant 0 : index
    %c104 = arith.constant 104 : index
    %69 = vector.load %arg2[%c0_24, %c104] : memref<8x128xf32, #tpu.memory_space<vmem>>, vector<8x8xf32>
    tpu.vector_store %arg2[%c0_24, %c104], %68 {strides = array<i32>} : memref<8x128xf32, #tpu.memory_space<vmem>>, vector<8x8xf32>,
    %70 = vector.extract_strided_slice %41 {offsets = [0, 1], sizes = [8, 8], strides = [1, 1]} : vector<8x23xf32> to vector<8x8xf32>
    %c0_25 = arith.constant 0 : index
    %c112 = arith.constant 112 : index
    %71 = vector.load %arg2[%c0_25, %c112] : memref<8x128xf32, #tpu.memory_space<vmem>>, vector<8x8xf32>
    tpu.vector_store %arg2[%c0_25, %c112], %70 {strides = array<i32>} : memref<8x128xf32, #tpu.memory_space<vmem>>, vector<8x8xf32>,
    %72 = vector.extract_strided_slice %41 {offsets = [0, 0], sizes = [8, 8], strides = [1, 1]} : vector<8x23xf32> to vector<8x8xf32>
    %c0_26 = arith.constant 0 : index
    %c120 = arith.constant 120 : index
    %73 = vector.load %arg2[%c0_26, %c120] : memref<8x128xf32, #tpu.memory_space<vmem>>, vector<8x8xf32>
    tpu.vector_store %arg2[%c0_26, %c120], %72 {strides = array<i32>} : memref<8x128xf32, #tpu.memory_space<vmem>>, vector<8x8xf32>,
    return
  }
  func.func @transform_0(%arg0: i32) -> (i32, i32) {
    %c0_i32 = arith.constant 0 : i32
    %c0_i32_0 = arith.constant 0 : i32
    %c0_i32_1 = arith.constant 0 : i32
    return %c0_i32, %c0_i32_0 : i32, i32
  }
  func.func @transform_1(%arg0: i32) -> (i32, i32) {
    %c0_i32 = arith.constant 0 : i32
    %c0_i32_0 = arith.constant 0 : i32
    return %c0_i32, %arg0 : i32, i32
  }
}

</mosaic_0001>

<bundles_post_ra>
// kernel: tpu_custom_call.1
= control target key start
LH: loop header
LB: loop body
LE: loop exit
PB: predicated region body
PF: predicated region fallthrough
CT: control target
= control target key end

     0   :  { %6 = vsyncpa [#allocation3], 0  ;;  %s402_s0 = inlined_call_operand.hbm [shape: f32[8,32], index: 0, kind: input, shape index: {}]   ;;  %s403_s1 = inlined_call_operand.hbm [shape: f32[8,128], index: 1, kind: output, shape index: {}]  }
   0x1   :  { %7 = vsyncpa [#allocation4], 0  ;;  %s345_s6 = smov [#allocation2]   ;;  %s297_s10 = scalar_lea.hbm %s402_s0, 128 }
   0x2   :  { %s14_s7 = sshll.u32 %s345_s6, 4  ;;  %p298_p0 = scmp.ne.s32.totalorder %s402_s0, %s297_s10  ;;  %s15_s7 = int_to_ptr.vmem [resolvable:$true] %s14_s7 }
   0x3   :  { %p301_p1 = scmp.lt.u32.totalorder %s297_s10, %s402_s0 }
   0x5   :  { %p303_p2 = pnand %p301_p1, %p298_p0 }
   0x7   :  { %306 = shalt.err (!%p303_p2)
}
   0x8   :  { %s307_s15 = scalar_lea.vmem %s15_s7, 128  ;;  %p312_p4 = scmp.lt.s32.totalorder %s15_s7, %s15_s7 }
   0x9   :  { %p308_p3 = scmp.ne.s32.totalorder %s15_s7, %s307_s15  ;;  %p313_p5 = scmp.lt.s32.totalorder %s307_s15, %s307_s15 }
   0xb   :  { %p314_p6 = por %p313_p5, %p312_p4 }
   0xd   :  { %p315_p7 = pnand %p314_p6, %p308_p3 }
   0xf   :  { %318 = shalt.err (!%p315_p7)
}
  0x10   :  { %17 = dma.hbm_to_vmem [thread:$0]  %s402_s0, 128, %s15_s7, [#allocation3]  }
  0x11   :  { %341 = dma.done.wait [#allocation3], 128  }
  0x12   :  { %342 = vsyncadd [#allocation3], 4294967168  ;;  %v22_v0 = vlaneseq  ;;  %v346_v1 = vmov 0.0|0.0   ;;  %vm347_vm0 = vmmov 0   ;;  %v348_v3 = vmov 0.0   ;;  %v66_v28 = vld [vmem:[#allocation2] sm:$0xff] }
  0x13   :  { %264 = vmatprep.subr.bf16.mxu0 %v346_v1  ;;  %261 = vmatprep.mubr.msk.f32.mxu0 %vm347_vm0, %v348_v3  ;;  %v349_v19 = vmov 0   ;;  %v350_v27 = vmov 1.0|1.0   ;;  %vm67_vm11 = vcmask 261120   ;;  %s351_s0 = smov 3   ;;  %s352_s18 = smov 113  }
  0x14   :  { %v23_v2 = vand.u32 127, %v22_v0  ;;  %v50_v17 = vshrl.u32 %v22_v0, 7  ;;  %s353_s19 = smov 12   ;;  %s354_s20 = smov 122   ;;  %vm145_vm12 = vcmask 64512   ;;  %vm150_vm13 = vcmask 130112  }
  0x15   :  { %s355_s21 = smov 30   ;;  %s356_s22 = smov 21   ;;  %vm155_vm14 = vcmask 195712   ;;  %vm160_vm15 = vcmask 261312   ;;  %vm165_vm0 = vcmask 326912  }
  0x16   :  { %v237_v4 = vadd.s32 4294967281, %v23_v2  ;;  %v51_v22 = vadd.s32 8, %v50_v17  ;;  %v52_v23 = vadd.s32 16, %v50_v17  ;;  %v53_v24 = vadd.s32 24, %v50_v17  ;;  %s357_s23 = smov 48   ;;  %s358_s24 = smov 39  }
  0x17   :  { %s359_s25 = smov 66   ;;  %s360_s26 = smov 57  }
  0x18   :  { %v27_v5 = vsub.s32 0, %v237_v4  ;;  %s361_s27 = smov 84   ;;  %s362_s28 = smov 75  }
  0x19   :  { %s363_s29 = smov 102   ;;  %s364_s30 = smov 93  }
  0x1a   :  { %v30_v6 = vsub.s32 0, %v27_v5  ;;  %vm28_vm2 = vcmp.lt.s32.totalorder %v27_v5, 0  ;;  %s365_s2 = smov 120   ;;  %s366_s3 = smov 111  }
  0x1b   :  { %v29_v20 = vsel %vm28_vm2, 16, %v349_v19  ;;  %vm175_vm2 = vcmask 458112   ;;  %s367_s4 = smov [#allocation5]  }
  0x1c   :  { %v238_v7 = vmin.u32 %v30_v6, %v27_v5  ;;  %s228_s5 = sshll.u32 %s367_s4, 4  ;;  %s229_s5 = int_to_ptr.vmem [resolvable:$true] %s228_s5 }
  0x1d   :  { %s319_s6 = scalar_lea.vmem %s229_s5, 128  ;;  %p324_p9 = scmp.lt.s32.totalorder %s229_s5, %s229_s5 }
  0x1e   :  { %vm33_vm1 = vcmp.gt.s32.totalorder %v238_v7, 1  ;;  %vm32_vm3 = vcmp.lt.s32.totalorder %v238_v7, 8  ;;  %p320_p8 = scmp.ne.s32.totalorder %s229_s5, %s319_s6  ;;  %p325_p10 = scmp.lt.s32.totalorder %s319_s6, %s319_s6 }
  0x1f   :  { %v34_v8 = vsel %vm33_vm1, %v238_v7, 1  ;;  %vm170_vm1 = vcmask 392512  }
  0x20   :  { %v35_v9 = vcvt.s32.f32 %v34_v8  ;;  %p326_p11 = por %p325_p10, %p324_p9 }
  0x22   :  { %v37_v10 = vmul.f32 0.125, %v35_v9  ;;  %p327_p12 = pnand %p326_p11, %p320_p8 }
  0x24   :  { %295 = vlog2.f32 %v37_v10 }
  0x2e   :  { %v296_v11 = vpop.eup %295 }
  0x2f   :  { %v39_v12 = vmul.f32 0.6931472, %v296_v11 }
  0x31   :  { %v41_v13 = vmul.f32 0.36067376, %v39_v12 }
  0x33   :  { %v42_v14 = vmul.f32 8.0, %v41_v13 }
  0x35   :  { %v270_v15 = vtrunc.f32 %v42_v14 }
  0x37   :  { %v271_v16 = vcvt.f32.s32 %v270_v15 }
  0x39   :  { %v44_v18 = vadd.s32 8, %v271_v16 }
  0x3b   :  { %vm45_vm4 = vcmp.lt.s32.totalorder %v44_v18, 15 }
  0x3c   :  { %v46_v21 = vsel %vm45_vm4, %v44_v18, 15  ;;  %vm185_vm4 = vcmask 589312  }
  0x3d   :  { %v47_v25 = vsel %vm32_vm3, %v238_v7, %v46_v21  ;;  %vm180_vm3 = vcmask 523712  }
  0x3e   :  { %v48_v26 = vadd.s32 %v47_v25, %v29_v20 }
  0x40   :  { %vm54_vm5 = vcmp.eq.s32.totalorder %v50_v17, %v48_v26  ;;  %vm55_vm6 = vcmp.eq.s32.totalorder %v51_v22, %v48_v26  ;;  %vm56_vm7 = vcmp.eq.s32.totalorder %v52_v23, %v48_v26  ;;  %vm57_vm8 = vcmp.eq.s32.totalorder %v53_v24, %v48_v26 }
  0x41   :  { %vm265_vm9 = vmpackc.low %vm55_vm6, %vm54_vm5  ;;  %vm190_vm5 = vcmask 654912   ;;  %vm195_vm6 = vcmask 720512  }
  0x42   :  { %266 = vmatpush3.bf16.msk.msra.mxu0 %vm265_vm9, %v350_v27  ;;  %vm268_vm10 = vmpackc.low %vm57_vm8, %vm56_vm7  ;;  %vm200_vm7 = vcmask 786112   ;;  %vm205_vm8 = vcmask 851712   ;;  %vm210_vm9 = vcmask 917312  }
  0x43   :  { %267 = vmatprep.subr.bf16.mxu0 %v346_v1 }
  0x46   :  { %269 = vmatpush3.bf16.msk.msra.mxu0 %vm268_vm10, %v350_v27  ;;  %vm215_vm10 = vcmask 982912  }
  0x49   :  { %262 = vmatmul.mubr.msk.f32.vlgmr.msra.gmra.mrb[0].mxu0 %vm67_vm11, %v66_v28  ;;  %vm220_vm11 = vcmask 1048512  }
 0x11c   :  { %v137_v29 = vpop.f32.mrb[0].mxu0 }
 0x11d   :  { %152 = vrot.lane.b32.xlu1 %v137_v29, %s351_s0  ;;  %142 = vrot.lane.b32.xlu0 %v137_v29, %s352_s18  ;;  %v263_v30 = vpop.f32.mrb[1].mxu0 }
 0x121   :  { %157 = vrot.lane.b32.xlu1 %v137_v29, %s353_s19  ;;  %147 = vrot.lane.b32.xlu0 %v137_v29, %s354_s20 }
 0x125   :  { %167 = vrot.lane.b32.xlu1 %v137_v29, %s355_s21  ;;  %162 = vrot.lane.b32.xlu0 %v137_v29, %s356_s22 }
 0x129   :  { %177 = vrot.lane.b32.xlu1 %v137_v29, %s357_s23  ;;  %172 = vrot.lane.b32.xlu0 %v137_v29, %s358_s24 }
 0x12d   :  { %187 = vrot.lane.b32.xlu1 %v137_v29, %s359_s25  ;;  %182 = vrot.lane.b32.xlu0 %v137_v29, %s360_s26 }
 0x131   :  { %197 = vrot.lane.b32.xlu1 %v137_v29, %s361_s27  ;;  %192 = vrot.lane.b32.xlu0 %v137_v29, %s362_s28 }
 0x135   :  { %207 = vrot.lane.b32.xlu1 %v137_v29, %s363_s29  ;;  %202 = vrot.lane.b32.xlu0 %v137_v29, %s364_s30 }
 0x139   :  { %217 = vrot.lane.b32.xlu1 %v137_v29, %s365_s2  ;;  %212 = vrot.lane.b32.xlu0 %v137_v29, %s366_s3 }
 0x18f   :  { %v153_v31 = vpop.permute.xlu1 %152  ;;  %v143_v32 = vpop.permute.xlu0 %142 }
 0x190   :  { %146 = vst.msk [vmem:[#allocation5] sm:$0xff] %vm145_vm12, %v143_v32 }
 0x193   :  { %v158_v33 = vpop.permute.xlu1 %157  ;;  %v148_v34 = vpop.permute.xlu0 %147 }
 0x194   :  { %151 = vst.msk [vmem:[#allocation5] sm:$0xff] %vm150_vm13, %v148_v34 }
 0x195   :  { %156 = vst.msk [vmem:[#allocation5] sm:$0xff] %vm155_vm14, %v153_v31 }
 0x196   :  { %161 = vst.msk [vmem:[#allocation5] sm:$0xff] %vm160_vm15, %v158_v33 }
 0x197   :  { %v168_v35 = vpop.permute.xlu1 %167  ;;  %v163_v36 = vpop.permute.xlu0 %162 }
 0x198   :  { %166 = vst.msk [vmem:[#allocation5] sm:$0xff] %vm165_vm0, %v163_v36 }
 0x199   :  { %171 = vst.msk [vmem:[#allocation5] sm:$0xff] %vm170_vm1, %v168_v35 }
 0x19b   :  { %v178_v37 = vpop.permute.xlu1 %177  ;;  %v173_v38 = vpop.permute.xlu0 %172 }
 0x19c   :  { %176 = vst.msk [vmem:[#allocation5] sm:$0xff] %vm175_vm2, %v173_v38 }
 0x19d   :  { %181 = vst.msk [vmem:[#allocation5] sm:$0xff] %vm180_vm3, %v178_v37 }
 0x19f   :  { %v188_v39 = vpop.permute.xlu1 %187  ;;  %v183_v40 = vpop.permute.xlu0 %182 }
 0x1a0   :  { %186 = vst.msk [vmem:[#allocation5] sm:$0xff] %vm185_vm4, %v183_v40 }
 0x1a1   :  { %191 = vst.msk [vmem:[#allocation5] sm:$0xff] %vm190_vm5, %v188_v39 }
 0x1a3   :  { %v198_v41 = vpop.permute.xlu1 %197  ;;  %v193_v42 = vpop.permute.xlu0 %192 }
 0x1a4   :  { %196 = vst.msk [vmem:[#allocation5] sm:$0xff] %vm195_vm6, %v193_v42 }
 0x1a5   :  { %201 = vst.msk [vmem:[#allocation5] sm:$0xff] %vm200_vm7, %v198_v41 }
 0x1a7   :  { %v208_v43 = vpop.permute.xlu1 %207  ;;  %v203_v44 = vpop.permute.xlu0 %202 }
 0x1a8   :  { %206 = vst.msk [vmem:[#allocation5] sm:$0xff] %vm205_vm8, %v203_v44 }
 0x1a9   :  { %211 = vst.msk [vmem:[#allocation5] sm:$0xff] %vm210_vm9, %v208_v43 }
 0x1ab   :  { %v218_v45 = vpop.permute.xlu1 %217  ;;  %v213_v46 = vpop.permute.xlu0 %212 }
 0x1ac   :  { %216 = vst.msk [vmem:[#allocation5] sm:$0xff] %vm215_vm10, %v213_v46 }
 0x1ad   :  { %221 = vst.msk [vmem:[#allocation5] sm:$0xff] %vm220_vm11, %v218_v45 }
 0x1ae   :  { %330 = shalt.err (!%p327_p12)
}
 0x1af   :  { %s331_s9 = scalar_lea.hbm %s403_s1, 128 }
 0x1b0   :  { %p332_p13 = scmp.ne.s32.totalorder %s403_s1, %s331_s9  ;;  %p335_p0 = scmp.lt.u32.totalorder %s331_s9, %s403_s1 }
 0x1b2   :  { %p337_p1 = pnand %p335_p0, %p332_p13 }
 0x1b4   :  { %340 = shalt.err (!%p337_p1)
}
 0x1b5   :  { %231 = dma.vmem_to_hbm [thread:$0]  %s229_s5, 128, %s403_s1, [#allocation4]  }
 0x1b6   :  { %343 = dma.done.wait [#allocation4], 128  }
 0x1b7   :  { %344 = vsyncadd [#allocation4], 4294967168 }
 0x1b8   :  { %235 = vsyncpa [#allocation3], 1 }
 0x1b9   :  { %236 = vsyncpa [#allocation4], 1 }

</bundles_post_ra>
